<compile_context>
chip_gen: v5e
topology: v5e:2x2
jax: 0.10.0
libtpu: 0.0.40
codegen_flags: <defaults>
</compile_context>

<pallas_src>
import functools
import math

import jax
import jax.numpy as jnp
from jax.experimental import pallas as pl
from jax.experimental.pallas import tpu as pltpu

HIDDEN = 64           # self.hidden_num in the PyTorch module
H2 = 2 * HIDDEN       # fused hidden width (actor lanes 0..63 | critic 64..127)


def _round_up(x, m):
    return ((x + m - 1) // m) * m


# --------------------------------------------------------------------------
# Kernel: fused actor+critic 3-layer MLP on one (TB, S) batch tile.
# Output tile is (R, TB): rows 0..A-1 = action_mean, row A = state value.
# --------------------------------------------------------------------------
def _fused_ac_kernel(x_ref, w1_ref, w2_ref, w3t_ref, b12_ref, b3_ref, out_ref,
                     *, action_dim):
    x = x_ref[...]                                   # (TB, S) f32

    # Layer 1: both nets use tanh -> apply to all 128 lanes.
    h = jnp.tanh(
        jnp.dot(x, w1_ref[...], preferred_element_type=jnp.float32)
        + b12_ref[0:1, :]
    )
    # Layer 2: block-diagonal weights keep actor / critic lanes independent.
    h = jnp.tanh(
        jnp.dot(h, w2_ref[...], preferred_element_type=jnp.float32)
        + b12_ref[1:2, :]
    )
    # Layer 3 directly in transposed orientation ("NT" matmul, q@k^T pattern):
    #   yt[n, t] = sum_k w3t[n, k] * h[t, k]      -> (R, TB)
    yt = jax.lax.dot_general(
        w3t_ref[...], h,
        dimension_numbers=(((1,), (1,)), ((), ())),
        preferred_element_type=jnp.float32,
    )
    yt = yt + b3_ref[...]                            # (R, TB) + (R, 1) lane bcast
    # Actor rows (< action_dim) get tanh; critic value row does not;
    # padding rows are don't-care (zeros, sliced away in the wrapper).
    row = jax.lax.broadcasted_iota(jnp.int32, yt.shape, 0)
    out_ref[...] = jnp.where(row < action_dim, jnp.tanh(yt), yt)


# --------------------------------------------------------------------------
# Wrapper: parameter packing, batch tiling, output slicing.
# --------------------------------------------------------------------------
def pack_params(params, action_dim):
    """Pack the 12 (in,out)-layout weight/bias arrays into 5 lane-friendly
    tensors.  Done once outside the kernel (pure layout plumbing)."""
    assert H2 == 128, "packing assumes hidden_num == 64"
    S = params["aw1"].shape[0]
    out_rows = _round_up(action_dim + 1, 8)          # sublane-aligned head rows

    w1 = jnp.concatenate([params["aw1"], params["cw1"]], axis=1)        # (S,128)

    w2 = jnp.zeros((H2, H2), jnp.float32)
    w2 = w2.at[:HIDDEN, :HIDDEN].set(params["aw2"])
    w2 = w2.at[HIDDEN:, HIDDEN:].set(params["cw2"])                     # (128,128)

    # Layer-3 weights stored pre-transposed: row n holds the weights producing
    # output n (actor outputs 0..A-1 use actor lanes, critic uses lanes 64..127).
    w3t = jnp.zeros((out_rows, H2), jnp.float32)
    w3t = w3t.at[:action_dim, :HIDDEN].set(params["aw3"].T)
    w3t = w3t.at[action_dim, HIDDEN:].set(params["cw3"][:, 0])          # (R,128)

    b12 = jnp.zeros((8, H2), jnp.float32)
    b12 = b12.at[0, :].set(jnp.concatenate([params["ab1"][0], params["cb1"][0]]))
    b12 = b12.at[1, :].set(jnp.concatenate([params["ab2"][0], params["cb2"][0]]))

    b3 = jnp.zeros((out_rows, 1), jnp.float32)
    b3 = b3.at[:action_dim, 0].set(params["ab3"][0])
    b3 = b3.at[action_dim, 0].set(params["cb3"][0, 0])

    return dict(w1=w1.astype(jnp.float32), w2=w2, w3t=w3t, b12=b12, b3=b3,
                state_dim=S, out_rows=out_rows)


def actor_critic_forward(state, packed, action_dim, *, tile_b=1024):
    """state: (B, H, W) float32. Returns (action_mean (B,A), state_val (B,1))."""
    assert tile_b % 128 == 0
    B = state.shape[0]
    S = state.shape[-2] * state.shape[-1]
    assert S == packed["state_dim"]
    x = state.reshape(B, S).astype(jnp.float32)   # Flatten(start_dim=-2, end_dim=-1)

    # Batch tile: either the whole (8-padded) batch, or a multiple of 128 so the
    # transposed output's lane dim stays aligned.  A few MiB of VMEM at most.
    TB = min(tile_b, _round_up(B, 8))
    Bp = _round_up(B, TB)
    if Bp != B:
        x = jnp.pad(x, ((0, Bp - B), (0, 0)))
    R = packed["out_rows"]
    grid = (pl.cdiv(Bp, TB),)

    w1, w2, w3t = packed["w1"], packed["w2"], packed["w3t"]
    b12, b3 = packed["b12"], packed["b3"]

    out = pl.pallas_call(
        functools.partial(_fused_ac_kernel, action_dim=action_dim),
        grid=grid,
        in_specs=[
            pl.BlockSpec((TB, S), lambda i: (i, 0)),        # activation stream
            pl.BlockSpec(w1.shape, lambda i: (0, 0)),       # resident weights
            pl.BlockSpec(w2.shape, lambda i: (0, 0)),
            pl.BlockSpec(w3t.shape, lambda i: (0, 0)),
            pl.BlockSpec(b12.shape, lambda i: (0, 0)),
            pl.BlockSpec(b3.shape, lambda i: (0, 0)),
        ],
        out_specs=pl.BlockSpec((R, TB), lambda i: (0, i)),  # transposed, lane-dense
        out_shape=jax.ShapeDtypeStruct((R, Bp), jnp.float32),
        compiler_params=pltpu.CompilerParams(
            dimension_semantics=("parallel",),              # v7x: both TCs
        ),
    )(x, w1, w2, w3t, b12, b3)

    action_mean = out[:action_dim, :B].T                    # (B, A)
    state_val = out[action_dim:action_dim + 1, :B].T        # (B, 1)
    return action_mean, state_val


def act(state, packed, action_dim, action_var, key):
    """Mirror of ActorCritic.act(state): sample from diag-Gaussian policy."""
    action_mean, state_val = actor_critic_forward(state, packed, action_dim)
    A = action_mean.shape[-1]
    std = jnp.sqrt(action_var)                                   # (A,)
    noise = jax.random.normal(key, action_mean.shape, dtype=jnp.float32)
    action = action_mean + noise * std
    diff = action - action_mean
    logprob = (
        -0.5 * jnp.sum(diff * diff / action_var, axis=-1)
        - 0.5 * jnp.sum(jnp.log(action_var))
        - 0.5 * A * math.log(2.0 * math.pi)
    )
    return action, logprob, state_val, action_mean, std


# --------------------------------------------------------------------------
# Parameter init (matches nn.Linear default U(-1/sqrt(fan_in), 1/sqrt(fan_in));
# weights stored as (in, out) for the y = x @ W + b convention).
# --------------------------------------------------------------------------
def init_params(key, state_dim, hidden, action_dim):
    keys = jax.random.split(key, 12)

    def lin(kw, kb, fan_in, fan_out):
        bound = 1.0 / math.sqrt(fan_in)
        w = jax.random.uniform(kw, (fan_in, fan_out), jnp.float32, -bound, bound)
        b = jax.random.uniform(kb, (1, fan_out), jnp.float32, -bound, bound)
        return w, b

    aw1, ab1 = lin(keys[0], keys[1], state_dim, hidden)
    aw2, ab2 = lin(keys[2], keys[3], hidden, hidden)
    aw3, ab3 = lin(keys[4], keys[5], hidden, action_dim)
    cw1, cb1 = lin(keys[6], keys[7], state_dim, hidden)
    cw2, cb2 = lin(keys[8], keys[9], hidden, hidden)
    cw3, cb3 = lin(keys[10], keys[11], hidden, 1)
    return dict(
        aw1=aw1, ab1=ab1, aw2=aw2, ab2=ab2, aw3=aw3, ab3=ab3,
        cw1=cw1, cb1=cb1, cw2=cw2, cb2=cb2, cw3=cw3, cb3=cb3,
    )


def _reference_forward(state, params):
    """Pure-JAX reference (unfused) for correctness checking."""
    B = state.shape[0]
    x = state.reshape(B, -1).astype(jnp.float32)
    a = jnp.tanh(x @ params["aw1"] + params["ab1"])
    a = jnp.tanh(a @ params["aw2"] + params["ab2"])
    a = jnp.tanh(a @ params["aw3"] + params["ab3"])
    c = jnp.tanh(x @ params["cw1"] + params["cb1"])
    c = jnp.tanh(c @ params["cw2"] + params["cb2"])
    c = c @ params["cw3"] + params["cb3"]
    return a, c


if __name__ == "__main__":
    # Small shapes consistent with the module: state (B, H, W), state_dim = H*W.
    B, H, W = 2, 4, 8
    state_dim = H * W          # 32
    hidden = HIDDEN            # 64
    action_dim = 4
    action_std_init = 0.6
    action_var = jnp.full((action_dim,), action_std_init * action_std_init,
                          dtype=jnp.float32)

    root = jax.random.PRNGKey(0)
    k_state, k_params, k_sample = jax.random.split(root, 3)

    state = jax.random.normal(k_state, (B, H, W), dtype=jnp.float32)
    params = init_params(k_params, state_dim, hidden, action_dim)
    packed = pack_params(params, action_dim)

    action, logprob, state_val, action_mean, std = act(
        state, packed, action_dim, action_var, k_sample
    )
    jax.block_until_ready((action, logprob, state_val, action_mean, std))

    # Shape checks.
    assert action.shape == (B, action_dim)
    assert logprob.shape == (B,)
    assert state_val.shape == (B, 1)
    assert action_mean.shape == (B, action_dim)
    assert std.shape == (action_dim,)

    # Numerical check against the unfused pure-JAX reference.
    ref_mean, ref_val = _reference_forward(state, params)
    assert jnp.allclose(action_mean, ref_mean, atol=1e-5, rtol=1e-5)
    assert jnp.allclose(state_val, ref_val, atol=1e-5, rtol=1e-5)

    print("KERNEL_OK")
</pallas_src>

<mosaic_0001>
module attributes {stable_mosaic.version = 11 : i64} {
  func.func @_fused_ac_kernel(%arg0: i32, %arg1: memref<8x32xf32, #tpu.memory_space<vmem>>, %arg2: memref<32x128xf32, #tpu.memory_space<vmem>>, %arg3: memref<128x128xf32, #tpu.memory_space<vmem>>, %arg4: memref<8x128xf32, #tpu.memory_space<vmem>>, %arg5: memref<8x128xf32, #tpu.memory_space<vmem>>, %arg6: memref<8x1xf32, #tpu.memory_space<vmem>>, %arg7: memref<8x8xf32, #tpu.memory_space<vmem>>) attributes {dimension_semantics = [#tpu.dimension_semantics<parallel>], iteration_bounds = array<i64: 1>, scalar_prefetch = 0 : i64, scratch_operands = 0 : i64, tpu.core_type = #tpu.core_type<tc>, window_params = [{transform_indices = @transform_0, window_bounds = array<i64: 8, 32>}, {pipeline_mode = #tpu.pipeline_mode<synchronous>, transform_indices = @transform_1, window_bounds = array<i64: 32, 128>}, {pipeline_mode = #tpu.pipeline_mode<synchronous>, transform_indices = @transform_2, window_bounds = array<i64: 128, 128>}, {pipeline_mode = #tpu.pipeline_mode<synchronous>, transform_indices = @transform_3, window_bounds = array<i64: 8, 128>}, {pipeline_mode = #tpu.pipeline_mode<synchronous>, transform_indices = @transform_4, window_bounds = array<i64: 8, 128>}, {pipeline_mode = #tpu.pipeline_mode<synchronous>, transform_indices = @transform_5, window_bounds = array<i64: 8, 1>}, {transform_indices = @transform_6, window_bounds = array<i64: 8, 8>}]} {
    %c0 = arith.constant 0 : index
    %c0_0 = arith.constant 0 : index
    %0 = vector.load %arg1[%c0, %c0_0] : memref<8x32xf32, #tpu.memory_space<vmem>>, vector<8x32xf32>
    %c0_1 = arith.constant 0 : index
    %c0_2 = arith.constant 0 : index
    %1 = vector.load %arg2[%c0_1, %c0_2] : memref<32x128xf32, #tpu.memory_space<vmem>>, vector<32x128xf32>
    %cst = arith.constant dense<0.000000e+00> : vector<8x128xf32>
    %2 = tpu.matmul %0, %1, %cst {dimension_numbers = #tpu.dot_dimension_numbers<[1], [0], [0], [1], [0, 0, 1, 1], [], []>} : vector<8x32xf32>, vector<32x128xf32>, vector<8x128xf32> -> vector<8x128xf32>
    %c0_3 = arith.constant 0 : index
    %c0_4 = arith.constant 0 : index
    %3 = vector.load %arg5[%c0_3, %c0_4] : memref<8x128xf32, #tpu.memory_space<vmem>>, vector<1x128xf32>
    %4 = vector.broadcast %3 : vector<1x128xf32> to vector<8x128xf32>
    %5 = arith.addf %2, %4 : vector<8x128xf32>
    %6 = math.tanh %5 : vector<8x128xf32>
    %c0_5 = arith.constant 0 : index
    %c0_6 = arith.constant 0 : index
    %7 = vector.load %arg3[%c0_5, %c0_6] : memref<128x128xf32, #tpu.memory_space<vmem>>, vector<128x128xf32>
    %cst_7 = arith.constant dense<0.000000e+00> : vector<8x128xf32>
    %8 = tpu.matmul %6, %7, %cst_7 {dimension_numbers = #tpu.dot_dimension_numbers<[1], [0], [0], [1], [0, 0, 1, 1], [], []>} : vector<8x128xf32>, vector<128x128xf32>, vector<8x128xf32> -> vector<8x128xf32>
    %c1 = arith.constant 1 : index
    %c0_8 = arith.constant 0 : index
    %9 = vector.load %arg5[%c1, %c0_8] : memref<8x128xf32, #tpu.memory_space<vmem>>, vector<1x128xf32>
    %10 = vector.broadcast %9 : vector<1x128xf32> to vector<8x128xf32>
    %11 = arith.addf %8, %10 : vector<8x128xf32>
    %12 = math.tanh %11 : vector<8x128xf32>
    %c0_9 = arith.constant 0 : index
    %c0_10 = arith.constant 0 : index
    %13 = vector.load %arg4[%c0_9, %c0_10] : memref<8x128xf32, #tpu.memory_space<vmem>>, vector<8x128xf32>
    %cst_11 = arith.constant dense<0.000000e+00> : vector<8x8xf32>
    %14 = tpu.matmul %13, %12, %cst_11 {dimension_numbers = #tpu.dot_dimension_numbers<[1], [1], [0], [0], [0, 0, 1, 0], [], []>} : vector<8x128xf32>, vector<8x128xf32>, vector<8x8xf32> -> vector<8x8xf32>
    %c0_12 = arith.constant 0 : index
    %c0_13 = arith.constant 0 : index
    %15 = vector.load %arg6[%c0_12, %c0_13] : memref<8x1xf32, #tpu.memory_space<vmem>>, vector<8x1xf32>
    %16 = vector.broadcast %15 : vector<8x1xf32> to vector<8x8xf32>
    %17 = arith.addf %14, %16 : vector<8x8xf32>
    %18 = tpu.iota {dimensions = array<i32: 0>} : vector<8x8xi32>
    %c4_i32 = arith.constant 4 : i32
    %19 = vector.broadcast %c4_i32 : i32 to vector<8x8xi32>
    %20 = arith.cmpi slt, %18, %19 : vector<8x8xi32>
    %21 = math.tanh %17 : vector<8x8xf32>
    %22 = arith.select %20, %21, %17 : vector<8x8xi1>, vector<8x8xf32>
    %c0_14 = arith.constant 0 : index
    %c0_15 = arith.constant 0 : index
    %23 = vector.load %arg7[%c0_14, %c0_15] : memref<8x8xf32, #tpu.memory_space<vmem>>, vector<8x8xf32>
    tpu.vector_store %arg7[%c0_14, %c0_15], %22 {strides = array<i32>} : memref<8x8xf32, #tpu.memory_space<vmem>>, vector<8x8xf32>,
    return
  }
  func.func @transform_0(%arg0: i32) -> (i32, i32) {
    %c0_i32 = arith.constant 0 : i32
    %c0_i32_0 = arith.constant 0 : i32
    return %arg0, %c0_i32 : i32, i32
  }
  func.func @transform_1(%arg0: i32) -> (i32, i32) {
    %c0_i32 = arith.constant 0 : i32
    %c0_i32_0 = arith.constant 0 : i32
    %c0_i32_1 = arith.constant 0 : i32
    return %c0_i32, %c0_i32_0 : i32, i32
  }
  func.func @transform_2(%arg0: i32) -> (i32, i32) {
    %c0_i32 = arith.constant 0 : i32
    %c0_i32_0 = arith.constant 0 : i32
    %c0_i32_1 = arith.constant 0 : i32
    return %c0_i32, %c0_i32_0 : i32, i32
  }
  func.func @transform_3(%arg0: i32) -> (i32, i32) {
    %c0_i32 = arith.constant 0 : i32
    %c0_i32_0 = arith.constant 0 : i32
    %c0_i32_1 = arith.constant 0 : i32
    return %c0_i32, %c0_i32_0 : i32, i32
  }
  func.func @transform_4(%arg0: i32) -> (i32, i32) {
    %c0_i32 = arith.constant 0 : i32
    %c0_i32_0 = arith.constant 0 : i32
    %c0_i32_1 = arith.constant 0 : i32
    return %c0_i32, %c0_i32_0 : i32, i32
  }
  func.func @transform_5(%arg0: i32) -> (i32, i32) {
    %c0_i32 = arith.constant 0 : i32
    %c0_i32_0 = arith.constant 0 : i32
    %c0_i32_1 = arith.constant 0 : i32
    return %c0_i32, %c0_i32_0 : i32, i32
  }
  func.func @transform_6(%arg0: i32) -> (i32, i32) {
    %c0_i32 = arith.constant 0 : i32
    %c0_i32_0 = arith.constant 0 : i32
    return %c0_i32, %arg0 : i32, i32
  }
}

</mosaic_0001>

<bundles_post_ra>
// kernel: tpu_custom_call.1
= control target key start
LH: loop header
LB: loop body
LE: loop exit
PB: predicated region body
PF: predicated region fallthrough
CT: control target
= control target key end

     0   :  { %11 = vsyncpa [#allocation3], 0  ;;  %s417_s0 = inlined_call_operand.vmem [shape: f32[8,32], index: 0, kind: input, shape index: {}]   ;;  %s418_s1 = inlined_call_operand.hbm [shape: f32[32,128], index: 1, kind: input, shape index: {}]   ;;  %s419_s2 = inlined_call_operand.hbm [shape: f32[128,128], index: 2, kind: input, shape index: {}]   ;;  %s420_s3 = inlined_call_operand.hbm [shape: f32[8,128], index: 3, kind: input, shape index: {}]   ;;  %s421_s4 = inlined_call_operand.hbm [shape: f32[8,128], index: 4, kind: input, shape index: {}]   ;;  %s422_s5 = inlined_call_operand.vmem [shape: f32[8,1], index: 5, kind: input, shape index: {}]   ;;  %s423_s6 = inlined_call_operand.hbm [shape: f32[8,8], index: 6, kind: output, shape index: {}]  }
   0x1   :  { %12 = vsyncpa [#allocation6], 0 }
   0x2   :  { %13 = vsyncpa [#allocation9], 0 }
   0x3   :  { %14 = vsyncpa [#allocation4], 0  ;;  %s34_s23 = sshll.u32 %s419_s2, 4  ;;  %s353_s24 = smov [#allocation5]   ;;  %s35_s23 = int_to_ptr.hbm [resolvable:$true] %s34_s23 }
   0x4   :  { %s36_s25 = sshll.u32 %s353_s24, 4  ;;  %s21_s28 = sshll.u32 %s418_s1, 4  ;;  %s37_s25 = int_to_ptr.vmem [resolvable:$true] %s36_s25  ;;  %s22_s28 = int_to_ptr.hbm [resolvable:$true] %s21_s28 }
   0x5   :  { %s354_s29 = smov 128   ;;  %s355_s30 = smov 8  }
   0x6   :  { %42 = dma.hbm_to_vmem [thread:$0]  %s35_s23, 2048, %s37_s25, [#allocation6], %s354_s29, %s354_s29, %s355_s30  }
   0x7   :  { %s356_s7 = smov [#allocation2]   ;;  %s48_s11 = sshll.u32 %s420_s3, 4  ;;  %s49_s11 = int_to_ptr.hbm [resolvable:$true] %s48_s11 }
   0x8   :  { %s23_s8 = sshll.u32 %s356_s7, 4  ;;  %s59_s13 = sshll.u32 %s421_s4, 4  ;;  %s24_s8 = int_to_ptr.vmem [resolvable:$true] %s23_s8  ;;  %s60_s13 = int_to_ptr.hbm [resolvable:$true] %s59_s13 }
   0x9   :  { %29 = dma.hbm_to_vmem [thread:$0]  %s22_s28, 512, %s24_s8, [#allocation3], %s354_s29, %s354_s29, %s355_s30  }
   0xa   :  { %s357_s14 = smov [#allocation7]   ;;  %s358_s1 = smov [#allocation8]  }
   0xb   :  { %s50_s15 = sshll.u32 %s357_s14, 4  ;;  %s61_s16 = sshll.u32 %s358_s1, 4  ;;  %s51_s15 = int_to_ptr.vmem [resolvable:$true] %s50_s15  ;;  %s62_s16 = int_to_ptr.vmem [resolvable:$true] %s61_s16 }
   0xc   :  { %53 = dma.hbm_to_vmem [thread:$0]  %s49_s11, 128, %s51_s15, [#allocation6]  }
   0xd   :  { %64 = dma.hbm_to_vmem [thread:$0]  %s60_s13, 128, %s62_s16, [#allocation9]  }
   0xe   :  { %345 = dma.done.wait [#allocation3], 512  }
   0xf   :  { %346 = vsyncadd [#allocation3], 4294966784 }
  0x10   :  { %347 = dma.done.wait [#allocation6], 2176  }
  0x11   :  { %348 = vsyncadd [#allocation6], 4294965120 }
  0x12   :  { %349 = dma.done.wait [#allocation9], 128  }
  0x13   :  { %350 = vsyncadd [#allocation9], 4294967168  ;;  %v87_v0 = vld [vmem:[#allocation2 + $0x18] sm:$0xff]  ;;  %v86_v1 = vld [vmem:[#allocation2 + $0x10] sm:$0xff]  ;;  %vm90_vm0 = vcmask 261120   ;;  %v359_v26 = vmov 0   ;;  %v181_v33 = vlaneseq }
  0x14   :  { %106 = vmatpush.msra.mxu0 %v87_v0  ;;  %v130_v2 = vld [vmem:[#allocation5 + $0x78] sm:$0xff]  ;;  %v85_v3 = vld [vmem:[#allocation2 + $0x8] sm:$0xff]  ;;  %v129_v4 = vld [vmem:[#allocation5 + $0x70] sm:$0xff]  ;;  %216 = vset.pattern.permute.xlu0 %v359_v26  ;;  %s360_s18 = smov [#allocation10]   ;;  %s195_s21 = sshll.u32 %s423_s6, 4  ;;  %vm186_vm2 = vcmask 64512   ;;  %s196_s21 = int_to_ptr.hbm [resolvable:$true] %s195_s21 }
  0x15   :  { %133 = vmatpush.msra.mxu1 %v130_v2  ;;  %v128_v5 = vld [vmem:[#allocation5 + $0x68] sm:$0xff]  ;;  %v84_v6 = vld [vmem:[#allocation2] sm:$0xff]  ;;  %v126_v9 = vld [vmem:[#allocation5 + $0x58] sm:$0xff]  ;;  %v182_v36 = vshrl.u32 %v181_v33, 7  ;;  %s193_s19 = sshll.u32 %s360_s18, 4  ;;  %s194_s19 = int_to_ptr.vmem [resolvable:$true] %s193_s19 }
  0x16   :  { %107 = vmatpush.msra.mxu0 %v86_v1  ;;  %v83_v7 = vld [vmem:[%s417_s0] sm:$0xff]  ;;  %v125_v10 = vld [vmem:[#allocation5 + $0x50] sm:$0xff]  ;;  %v124_v11 = vld [vmem:[#allocation5 + $0x48] sm:$0xff] }
  0x17   :  { %134 = vmatpush.msra.mxu1 %v129_v4  ;;  %v127_v8 = vld [vmem:[#allocation5 + $0x60] sm:$0xff]  ;;  %v122_v13 = vld [vmem:[#allocation5 + $0x38] sm:$0xff]  ;;  %v121_v14 = vld [vmem:[#allocation5 + $0x30] sm:$0xff]  ;;  %vm183_vm1 = vcmp.lt.s32.totalorder %v182_v36, 4 }
  0x18   :  { %108 = vmatpush.msra.mxu0 %v85_v3  ;;  %v123_v12 = vld [vmem:[#allocation5 + $0x40] sm:$0xff]  ;;  %v120_v15 = vld [vmem:[#allocation5 + $0x28] sm:$0xff]  ;;  %v118_v17 = vld [vmem:[#allocation5 + $0x18] sm:$0xff] }
  0x19   :  { %135 = vmatpush.msra.mxu1 %v128_v5  ;;  %v119_v16 = vld [vmem:[#allocation5 + $0x20] sm:$0xff]  ;;  %v117_v18 = vld [vmem:[#allocation5 + $0x10] sm:$0xff]  ;;  %v116_v19 = vld [vmem:[#allocation5 + $0x8] sm:$0xff] }
  0x1a   :  { %109 = vmatpush.msra.mxu0 %v84_v6  ;;  %v115_v20 = vld [vmem:[#allocation5] sm:$0xff]  ;;  %v217_v21 = vld [vmem:[#allocation8] ss:$0 sm:$0xff]  ;;  %v218_v27 = vld [vmem:[#allocation8 + $0x1] ss:$0 sm:$0xff] }
  0x1b   :  { %207 = vmatmul.msk.f32.vlgmr.msra.gmra.mxu0 %vm90_vm0, %v83_v7  ;;  %136 = vmatpush.msra.mxu1 %v127_v8  ;;  %v155_v25 = vld [vmem:[%s422_s5] sm:$0xff] }
  0x1c   :  { %158 = vperm.xlu0 %216, %v155_v25   ;;  %v154_v31 = vld [vmem:[#allocation7] sm:$0xff] }
  0x1d   :  { %137 = vmatpush.msra.mxu1 %v126_v9 }
  0x1f   :  { %138 = vmatpush.msra.mxu1 %v125_v10 }
  0x21   :  { %139 = vmatpush.msra.mxu1 %v124_v11 }
  0x23   :  { %140 = vmatpush.msra.mxu1 %v123_v12 }
  0x25   :  { %141 = vmatpush.msra.mxu1 %v122_v13 }
  0x27   :  { %142 = vmatpush.msra.mxu1 %v121_v14 }
  0x29   :  { %143 = vmatpush.msra.mxu1 %v120_v15 }
  0x2b   :  { %144 = vmatpush.msra.mxu1 %v119_v16 }
  0x2d   :  { %145 = vmatpush.msra.mxu1 %v118_v17 }
  0x2f   :  { %146 = vmatpush.msra.mxu1 %v117_v18 }
  0x31   :  { %147 = vmatpush.msra.mxu1 %v116_v19 }
  0x33   :  { %148 = vmatpush.msra.mxu1 %v115_v20 }
  0x8e   :  { %v159_v32 = vpop.permute.xlu0 %158 }
  0x98   :  { %v111_v22 = vpop.f32.mrf.mxu0 }
  0x99   :  { %v112_v23 = vadd.f32 %v217_v21, %v111_v22 }
  0x9b   :  { %219 = vtanh.f32 %v112_v23 }
  0xa1   :  { %v220_v24 = vpop.eup %219 }
  0xa2   :  { %149 = vmatmul.f32.vlgmr.msra.gmra.mxu1 %v220_v24 }
 0x11f   :  { %v150_v28 = vpop.f32.mrf.mxu1 }
 0x120   :  { %v151_v29 = vadd.f32 %v218_v27, %v150_v28 }
 0x122   :  { %221 = vtanh.f32 %v151_v29 }
 0x128   :  { %v222_v30 = vpop.eup %221 }
 0x129   :  { %176 = vmatpush.xpose.msra.mxu2 %v222_v30 }
 0x12c   :  { %177 = vmatmul.f32.vlgmr.msra.gmra.mxu2 %v154_v31 }
 0x1af   :  { %v178_v34 = vpop.f32.mrf.mxu2 }
 0x1b0   :  { %v179_v35 = vadd.f32 %v178_v34, %v159_v32 }
 0x1b2   :  { %223 = vtanh.f32 %v179_v35 }
 0x1b8   :  { %v224_v37 = vpop.eup %223 }
 0x1b9   :  { %v185_v38 = vsel %vm183_vm1, %v224_v37, %v179_v35 }
 0x1ba   :  { %187 = vst.msk [vmem:[#allocation10] sm:$0xff] %vm186_vm2, %v185_v38 }
 0x1bb   :  { %198 = dma.vmem_to_hbm [thread:$0]  %s194_s19, 128, %s196_s21, [#allocation4]  }
 0x1bc   :  { %351 = dma.done.wait [#allocation4], 128  }
 0x1bd   :  { %352 = vsyncadd [#allocation4], 4294967168 }
 0x1be   :  { %203 = vsyncpa [#allocation3], 1 }
 0x1bf   :  { %204 = vsyncpa [#allocation6], 1 }
 0x1c0   :  { %205 = vsyncpa [#allocation9], 1 }
 0x1c1   :  { %206 = vsyncpa [#allocation4], 1 }

</bundles_post_ra>
